<compile_context>
chip_gen: v7x
topology: tpu7x:2x2x1
jax: 0.10.0
libtpu: 0.0.40
codegen_flags: <defaults>
</compile_context>

<pallas_src>
import functools

import jax
import jax.numpy as jnp
from jax.experimental import pallas as pl
from jax.experimental.pallas import tpu as pltpu


def _forward_kernel(x_ref, w_emb_ref, w1_ref, w2_ref, b_ref, out_ref,
                    *, ns, n_emb, n_hidden):
    """One batch tile of the full forward pass.

    x_ref     : (TB, F)                bf16  input tile [stats | players | teams | opps]
    w_emb_ref : (F - ns, n_emb)        bf16  block-diag of [Wp, Wt, Wo] (already transposed)
    w1_ref    : (ns + n_emb, H)        bf16  linear stack layer 1 (transposed)
    w2_ref    : (H, n_out)             bf16  linear stack layer 2 (transposed)
    b_ref     : (1, n_emb + H + n_out) f32   packed biases [b_emb | b1 | b2]
    out_ref   : (TB, n_out)            f32
    """
    f32 = jnp.float32
    x = x_ref[...]                      # (TB, F) bf16
    xs = x[:, :ns]                      # raw game stats, passed through
    xrest = x[:, ns:]                   # player | team | opp id features

    b = b_ref[...]
    b_emb = b[:, :n_emb]
    b1 = b[:, n_emb:n_emb + n_hidden]
    b2 = b[:, n_emb + n_hidden:]

    # Three parallel embedding Linear+ReLU layers as one block-diagonal matmul.
    emb = jnp.dot(xrest, w_emb_ref[...], preferred_element_type=f32) + b_emb
    emb = jnp.maximum(emb, 0.0).astype(x.dtype)

    # Linear stack layer 1: concat([stats, player_emb, team_emb, opp_emb]) @ W1 + b1, ReLU.
    h_in = jnp.concatenate([xs, emb], axis=-1)
    h = jnp.dot(h_in, w1_ref[...], preferred_element_type=f32) + b1
    h = jnp.maximum(h, 0.0).astype(x.dtype)

    # Linear stack layer 2 + Sigmoid.
    logits = jnp.dot(h, w2_ref[...], preferred_element_type=f32) + b2
    out_ref[...] = jax.nn.sigmoid(logits).astype(out_ref.dtype)


def init_params(shape, key):
    """Deterministic parameter init matching the nn.Linear shapes in __init__.

    Weights stored already transposed ([in, out]) so the kernel computes x @ W
    (equivalent to PyTorch's x @ W_torch.T).
    """
    def linear(key, n_in, n_out):
        kw, kb = jax.random.split(key)
        bound = 1.0 / jnp.sqrt(jnp.float32(n_in))
        w = jax.random.uniform(kw, (n_in, n_out), jnp.float32, -bound, bound)
        b = jax.random.uniform(kb, (1, n_out), jnp.float32, -bound, bound)
        return w, b

    keys = jax.random.split(key, 5)
    n_lin_in = (shape['stats_input'] + shape['embedding_player']
                + shape['embedding_team'] + shape['embedding_opp'])
    params = {}
    params['wp'], params['bp'] = linear(keys[0], shape['players_input'], shape['embedding_player'])
    params['wt'], params['bt'] = linear(keys[1], shape['teams_input'], shape['embedding_team'])
    params['wo'], params['bo'] = linear(keys[2], shape['opps_input'], shape['embedding_opp'])
    params['w1'], params['b1'] = linear(keys[3], n_lin_in, shape['linear_stack'])
    params['w2'], params['b2'] = linear(keys[4], shape['linear_stack'], shape['stats_output'])
    return params


def neural_network_forward(x, params, shape, *, tb=512):
    """Pallas forward pass. x: [B, F] float32."""
    ns = shape['stats_input']
    np_ = shape['players_input']
    nt = shape['teams_input']
    no = shape['opps_input']
    ep = shape['embedding_player']
    et = shape['embedding_team']
    eo = shape['embedding_opp']
    nh = shape['linear_stack']
    nout = shape['stats_output']

    F = ns + np_ + nt + no
    n_emb = ep + et + eo

    B = x.shape[0]
    tb = max(8, min(int(tb), pl.cdiv(B, 8) * 8))     # batch tile, multiple of 8
    n_steps = pl.cdiv(B, tb)
    b_pad = n_steps * tb
    if b_pad != B:                                   # pad batch to a whole number of tiles
        x = jnp.pad(x, ((0, b_pad - B), (0, 0)))

    # --- parameter packing (wrapper glue, no per-row work) ---
    # Block-diagonal fusion of the three embedding weights; one packed bias vector.
    w_emb = jax.scipy.linalg.block_diag(params['wp'], params['wt'], params['wo'])
    b_packed = jnp.concatenate(
        [params['bp'], params['bt'], params['bo'], params['b1'], params['b2']], axis=1)

    bf16 = jnp.bfloat16
    x_bf = x.astype(bf16)
    w_emb_bf = w_emb.astype(bf16)
    w1_bf = params['w1'].astype(bf16)
    w2_bf = params['w2'].astype(bf16)
    b_f32 = b_packed.astype(jnp.float32)

    kernel = functools.partial(_forward_kernel, ns=ns, n_emb=n_emb, n_hidden=nh)

    grid_spec = pltpu.PrefetchScalarGridSpec(
        num_scalar_prefetch=0,
        grid=(n_steps,),
        in_specs=[
            pl.BlockSpec((tb, F), lambda i: (i, 0)),                 # streamed x tiles
            pl.BlockSpec((np_ + nt + no, n_emb), lambda i: (0, 0)),  # weights: VMEM-resident
            pl.BlockSpec((ns + n_emb, nh), lambda i: (0, 0)),
            pl.BlockSpec((nh, nout), lambda i: (0, 0)),
            pl.BlockSpec((1, n_emb + nh + nout), lambda i: (0, 0)),  # packed biases
        ],
        out_specs=pl.BlockSpec((tb, nout), lambda i: (i, 0)),
    )

    out = pl.pallas_call(
        kernel,
        out_shape=jax.ShapeDtypeStruct((b_pad, nout), jnp.float32),
        grid_spec=grid_spec,
        compiler_params=pltpu.CompilerParams(
            dimension_semantics=("parallel",)),
    )(x_bf, w_emb_bf, w1_bf, w2_bf, b_f32)

    return out[:B]


def reference_forward(x, params, shape):
    """Pure-JAX f32 reference (matches the PyTorch module up to f64->f32)."""
    ns = shape['stats_input']
    np_ = shape['players_input']
    nt = shape['teams_input']
    no = shape['opps_input']
    xs = x[:, :ns]
    xp = x[:, ns:ns + np_]
    xt = x[:, ns + np_:ns + np_ + nt]
    xo = x[:, ns + np_ + nt:ns + np_ + nt + no]
    pe = jax.nn.relu(xp @ params['wp'] + params['bp'])
    te = jax.nn.relu(xt @ params['wt'] + params['bt'])
    oe = jax.nn.relu(xo @ params['wo'] + params['bo'])
    xemb = jnp.concatenate([xs, pe, te, oe], axis=1)
    h = jax.nn.relu(xemb @ params['w1'] + params['b1'])
    return jax.nn.sigmoid(h @ params['w2'] + params['b2'])


def reference_forward_bf16(x, params, shape):
    """Pure-JAX reference emulating the kernel's bf16-in / f32-accumulate math."""
    ns = shape['stats_input']
    bf, f32 = jnp.bfloat16, jnp.float32
    w_emb = jax.scipy.linalg.block_diag(params['wp'], params['wt'], params['wo']).astype(bf)
    b_emb = jnp.concatenate([params['bp'], params['bt'], params['bo']], axis=1)
    xb = x.astype(bf)
    xs, xrest = xb[:, :ns], xb[:, ns:]
    emb = jnp.maximum(jnp.dot(xrest, w_emb, preferred_element_type=f32) + b_emb, 0.0).astype(bf)
    h_in = jnp.concatenate([xs, emb], axis=-1)
    h = jnp.maximum(jnp.dot(h_in, params['w1'].astype(bf), preferred_element_type=f32)
                    + params['b1'], 0.0).astype(bf)
    return jax.nn.sigmoid(jnp.dot(h, params['w2'].astype(bf), preferred_element_type=f32)
                          + params['b2'])


if __name__ == "__main__":
    shape = {
        'stats_input': 16,
        'players_input': 32,
        'teams_input': 8,
        'opps_input': 8,
        'embedding_player': 16,
        'embedding_team': 8,
        'embedding_opp': 8,
        'linear_stack': 32,
        'stats_output': 8,
    }
    B = 512
    F = (shape['stats_input'] + shape['players_input']
         + shape['teams_input'] + shape['opps_input'])

    key = jax.random.PRNGKey(0)
    kx, kp = jax.random.split(key)
    x = jax.random.normal(kx, (B, F), jnp.float32)
    params = init_params(shape, kp)

    out = neural_network_forward(x, params, shape, tb=128)   # 4 grid steps
    out = jax.block_until_ready(out)

    ref_bf16 = reference_forward_bf16(x, params, shape)
    ref_f32 = reference_forward(x, params, shape)
    assert out.shape == (B, shape['stats_output'])
    assert jnp.allclose(out, ref_bf16, atol=1e-3, rtol=1e-3), "mismatch vs bf16-emulated reference"
    assert jnp.allclose(out, ref_f32, atol=3e-2, rtol=3e-2), "mismatch vs f32 reference"

    print("KERNEL_OK")
</pallas_src>

<mosaic_0001>
module attributes {stable_mosaic.version = 11 : i64} {
  func.func @_forward_kernel(%arg0: i32, %arg1: memref<128x64xbf16, #tpu.memory_space<vmem>>, %arg2: memref<48x32xbf16, #tpu.memory_space<vmem>>, %arg3: memref<48x32xbf16, #tpu.memory_space<vmem>>, %arg4: memref<32x8xbf16, #tpu.memory_space<vmem>>, %arg5: memref<1x72xf32, #tpu.memory_space<vmem>>, %arg6: memref<128x8xf32, #tpu.memory_space<vmem>>) attributes {dimension_semantics = [#tpu.dimension_semantics<parallel>], iteration_bounds = array<i64: 4>, scalar_prefetch = 0 : i64, scratch_operands = 0 : i64, tpu.core_type = #tpu.core_type<tc>, window_params = [{transform_indices = @transform_0, window_bounds = array<i64: 128, 64>}, {pipeline_mode = #tpu.pipeline_mode<synchronous>, transform_indices = @transform_1, window_bounds = array<i64: 48, 32>}, {pipeline_mode = #tpu.pipeline_mode<synchronous>, transform_indices = @transform_2, window_bounds = array<i64: 48, 32>}, {pipeline_mode = #tpu.pipeline_mode<synchronous>, transform_indices = @transform_3, window_bounds = array<i64: 32, 8>}, {pipeline_mode = #tpu.pipeline_mode<synchronous>, transform_indices = @transform_4, window_bounds = array<i64: 1, 72>}, {transform_indices = @transform_5, window_bounds = array<i64: 128, 8>}]} {
    %c0 = arith.constant 0 : index
    %c0_0 = arith.constant 0 : index
    %0 = vector.load %arg1[%c0, %c0_0] : memref<128x64xbf16, #tpu.memory_space<vmem>>, vector<128x64xbf16>
    %1 = vector.extract_strided_slice %0 {offsets = [0, 0], sizes = [128, 16], strides = [1, 1]} : vector<128x64xbf16> to vector<128x16xbf16>
    %2 = vector.extract_strided_slice %0 {offsets = [0, 16], sizes = [128, 48], strides = [1, 1]} : vector<128x64xbf16> to vector<128x48xbf16>
    %c0_1 = arith.constant 0 : index
    %c0_2 = arith.constant 0 : index
    %3 = vector.load %arg5[%c0_1, %c0_2] : memref<1x72xf32, #tpu.memory_space<vmem>>, vector<1x72xf32>
    %4 = vector.extract_strided_slice %3 {offsets = [0, 0], sizes = [1, 32], strides = [1, 1]} : vector<1x72xf32> to vector<1x32xf32>
    %5 = vector.extract_strided_slice %3 {offsets = [0, 32], sizes = [1, 32], strides = [1, 1]} : vector<1x72xf32> to vector<1x32xf32>
    %6 = vector.extract_strided_slice %3 {offsets = [0, 64], sizes = [1, 8], strides = [1, 1]} : vector<1x72xf32> to vector<1x8xf32>
    %c0_3 = arith.constant 0 : index
    %c0_4 = arith.constant 0 : index
    %7 = vector.load %arg2[%c0_3, %c0_4] : memref<48x32xbf16, #tpu.memory_space<vmem>>, vector<48x32xbf16>
    %cst = arith.constant dense<0.000000e+00> : vector<128x32xf32>
    %8 = tpu.matmul %2, %7, %cst {dimension_numbers = #tpu.dot_dimension_numbers<[1], [0], [0], [1], [0, 0, 1, 1], [], []>} : vector<128x48xbf16>, vector<48x32xbf16>, vector<128x32xf32> -> vector<128x32xf32>
    %9 = vector.broadcast %4 : vector<1x32xf32> to vector<128x32xf32>
    %10 = arith.addf %8, %9 : vector<128x32xf32>
    %cst_5 = arith.constant 0.000000e+00 : f32
    %11 = vector.broadcast %cst_5 : f32 to vector<128x32xf32>
    %12 = arith.maximumf %10, %11 : vector<128x32xf32>
    %13 = arith.truncf %12 : vector<128x32xf32> to vector<128x32xbf16>
    %14 = tpu.concatenate %1, %13 in 1 : vector<128x16xbf16>, vector<128x32xbf16> -> vector<128x48xbf16>
    %c0_6 = arith.constant 0 : index
    %c0_7 = arith.constant 0 : index
    %15 = vector.load %arg3[%c0_6, %c0_7] : memref<48x32xbf16, #tpu.memory_space<vmem>>, vector<48x32xbf16>
    %cst_8 = arith.constant dense<0.000000e+00> : vector<128x32xf32>
    %16 = tpu.matmul %14, %15, %cst_8 {dimension_numbers = #tpu.dot_dimension_numbers<[1], [0], [0], [1], [0, 0, 1, 1], [], []>} : vector<128x48xbf16>, vector<48x32xbf16>, vector<128x32xf32> -> vector<128x32xf32>
    %17 = vector.broadcast %5 : vector<1x32xf32> to vector<128x32xf32>
    %18 = arith.addf %16, %17 : vector<128x32xf32>
    %cst_9 = arith.constant 0.000000e+00 : f32
    %19 = vector.broadcast %cst_9 : f32 to vector<128x32xf32>
    %20 = arith.maximumf %18, %19 : vector<128x32xf32>
    %21 = arith.truncf %20 : vector<128x32xf32> to vector<128x32xbf16>
    %c0_10 = arith.constant 0 : index
    %c0_11 = arith.constant 0 : index
    %22 = vector.load %arg4[%c0_10, %c0_11] : memref<32x8xbf16, #tpu.memory_space<vmem>>, vector<32x8xbf16>
    %cst_12 = arith.constant dense<0.000000e+00> : vector<128x8xf32>
    %23 = tpu.matmul %21, %22, %cst_12 {dimension_numbers = #tpu.dot_dimension_numbers<[1], [0], [0], [1], [0, 0, 1, 1], [], []>} : vector<128x32xbf16>, vector<32x8xbf16>, vector<128x8xf32> -> vector<128x8xf32>
    %24 = vector.broadcast %6 : vector<1x8xf32> to vector<128x8xf32>
    %25 = arith.addf %23, %24 : vector<128x8xf32>
    %26 = arith.negf %25 : vector<128x8xf32>
    %27 = math.exp %26 : vector<128x8xf32>
    %cst_13 = arith.constant 1.000000e+00 : f32
    %28 = vector.broadcast %cst_13 : f32 to vector<128x8xf32>
    %29 = arith.addf %28, %27 : vector<128x8xf32>
    %30 = arith.divf %28, %29 : vector<128x8xf32>
    %c0_14 = arith.constant 0 : index
    %c0_15 = arith.constant 0 : index
    %31 = vector.load %arg6[%c0_14, %c0_15] : memref<128x8xf32, #tpu.memory_space<vmem>>, vector<128x8xf32>
    tpu.vector_store %arg6[%c0_14, %c0_15], %30 {strides = array<i32>} : memref<128x8xf32, #tpu.memory_space<vmem>>, vector<128x8xf32>,
    return
  }
  func.func @transform_0(%arg0: i32) -> (i32, i32) {
    %c0_i32 = arith.constant 0 : i32
    %c0_i32_0 = arith.constant 0 : i32
    return %arg0, %c0_i32 : i32, i32
  }
  func.func @transform_1(%arg0: i32) -> (i32, i32) {
    %c0_i32 = arith.constant 0 : i32
    %c0_i32_0 = arith.constant 0 : i32
    %c0_i32_1 = arith.constant 0 : i32
    return %c0_i32, %c0_i32_0 : i32, i32
  }
  func.func @transform_2(%arg0: i32) -> (i32, i32) {
    %c0_i32 = arith.constant 0 : i32
    %c0_i32_0 = arith.constant 0 : i32
    %c0_i32_1 = arith.constant 0 : i32
    return %c0_i32, %c0_i32_0 : i32, i32
  }
  func.func @transform_3(%arg0: i32) -> (i32, i32) {
    %c0_i32 = arith.constant 0 : i32
    %c0_i32_0 = arith.constant 0 : i32
    %c0_i32_1 = arith.constant 0 : i32
    return %c0_i32, %c0_i32_0 : i32, i32
  }
  func.func @transform_4(%arg0: i32) -> (i32, i32) {
    %c0_i32 = arith.constant 0 : i32
    %c0_i32_0 = arith.constant 0 : i32
    %c0_i32_1 = arith.constant 0 : i32
    return %c0_i32, %c0_i32_0 : i32, i32
  }
  func.func @transform_5(%arg0: i32) -> (i32, i32) {
    %c0_i32 = arith.constant 0 : i32
    %c0_i32_0 = arith.constant 0 : i32
    return %arg0, %c0_i32 : i32, i32
  }
}

</mosaic_0001>

<bundles_post_ra>
// kernel: tpu_custom_call.1
= control target key start
LH: loop header
LB: loop body
LE: loop exit
PB: predicated region body
PF: predicated region fallthrough
CT: control target
= control target key end

     0   :  { %s1305_s18 = smov 0   ;;  %s1497_s0 = inlined_call_operand.vmem [shape: bf16[512,64], index: 0, kind: input, shape index: {}]   ;;  %s1498_s1 = inlined_call_operand.vmem [shape: bf16[48,32], index: 1, kind: input, shape index: {}]   ;;  %s1499_s2 = inlined_call_operand.vmem [shape: bf16[48,32], index: 2, kind: input, shape index: {}]   ;;  %s1500_s3 = inlined_call_operand.vmem [shape: bf16[32,8], index: 3, kind: input, shape index: {}]   ;;  %s1501_s4 = inlined_call_operand.vmem [shape: f32[1,72], index: 4, kind: input, shape index: {}]   ;;  %s1502_s5 = inlined_call_operand.vmem [shape: f32[512,8], index: 5, kind: output, shape index: {}]  }
   0x1 LB: > { %s1001_s19 = sadd.s32 4294967295, %s1269_s18   ;;  %p1005_p0 = scmp.ge.s32.totalorder %s1269_s18, 1  ;;  %s1269_s18 = sphi %s1305_s18, %s15_s18  }
   0x2   : > { %p188_p1 = scmp.lt.s32.totalorder %s1269_s18, 5 }
   0x4   : > { %p189_p2 = pnand %p1005_p0, %p188_p1 }
   0x5   : > { %s1006_s20 = sshll.u32 (!%p189_p2), %s1001_s19, 4  ;;  %v1191_v0 = vld [vmem:[%s1498_s1] sm:$0xff] (!%p189_p2)   ;;  %v1192_v1 = vld [vmem:[%s1498_s1 + $0x8] sm:$0xff] (!%p189_p2)   ;;  %v1193_v2 = vld [vmem:[%s1498_s1 + $0x10] sm:$0xff] (!%p189_p2)   ;;  %s1271_s6 = smov (!%p189_p2), 112   ;;  %vm332_vm0 = vcmask (!%p189_p2), 392192  }
   0x6   : > { %192 = sbr.rel (%p189_p2) target bundleno = 965 (0x3c5), region = 40  ;;  %p217_p3 = scmp.lt.s32.totalorder (!%p189_p2), %s1006_s20, 63  ;;  %1101 = vmatprep.subr.bf16.mxu0 (!%p189_p2), %v1191_v0  ;;  %1165 = vmatprep.subr.bf16.mxu1 (!%p189_p2), %v1191_v0  ;;  %v1194_v19 = vld [vmem:[%s1499_s2] sm:$0xff] (!%p189_p2)   ;;  %v1195_v20 = vld [vmem:[%s1499_s2 + $0x8] sm:$0xff] (!%p189_p2)   ;;  %v1196_v21 = vld [vmem:[%s1499_s2 + $0x10] sm:$0xff] (!%p189_p2)   ;;  %vm502_vm1 = vcmask (!%p189_p2), 130048  }
   0x7   : > { %1102 = vmatpush3.bf16.msra.mxu0 (!%p189_p2), %v1191_v0  ;;  %1168 = vmatpush3.bf16.msra.mxu1 (!%p189_p2), %v1191_v0  ;;  %v1372_v22 = vld [vmem:[%s1501_s4] ss:$0 sm:$0xff] (!%p189_p2)  ;;  %s1272_s15 = smov (!%p189_p2), 16   ;;  %s1273_s19 = smov (!%p189_p2), 96   ;;  %vm710_vm2 = vcmask (!%p189_p2), 261120   ;;  %vm928_vm3 = vcmask (!%p189_p2), 64512  }
   0x8   : > { %1103 = vmatprep.subr.bf16.mxu0 (!%p189_p2), %v1192_v1  ;;  %1166 = vmatprep.subr.bf16.mxu1 (!%p189_p2), %v1192_v1  ;;  %s1274_s23 = smov (!%p189_p2), 64  }
   0xb   : > { %1104 = vmatpush3.bf16.msra.mxu0 (!%p189_p2), %v1192_v1  ;;  %1169 = vmatpush3.bf16.msra.mxu1 (!%p189_p2), %v1192_v1 }
   0xc   : > { %1105 = vmatprep.subr.bf16.mxu0 (!%p189_p2), %v1193_v2  ;;  %1167 = vmatprep.subr.bf16.mxu1 (!%p189_p2), %v1193_v2 }
   0xd   : > { %s1504_s20 = smov (!%p217_p3, %s1006_s20), 63 }
   0xe   : > { %s1007_s25 = sshll.u32 %s1504_s20, 2  ;;  %s1009_s24 = sshll.u32 %s1504_s20, 3 }
   0xf   : > { %s220_s30 = scalar_lea.vmem %s1497_s0, %s1007_s25  ;;  %1106 = vmatpush3.bf16.msra.mxu0 %v1193_v2  ;;  %1170 = vmatpush3.bf16.msra.mxu1 %v1193_v2  ;;  %s1457_s27 = scalar_lea.vmem %s1502_s5, %s1009_s24 }
  0x10   : > { %v1328_v3 = vld [vmem:[%s220_s30] sm:$0xff]   ;;  %v1330_v4 = vld [vmem:[%s220_s30 + $0x8] sm:$0xff]   ;;  %v1333_v5 = vld [vmem:[%s220_s30 + $0x10] sm:$0xff]   ;;  %1123 = vmatprep.subr.bf16.mxu1 %v1194_v19 }
  0x11   : > { %298 = vrot.lane.b32.xlu0 %v1328_v3, %s1271_s6  ;;  %302 = vrot.lane.b32.xlu1 %v1333_v5, %s1271_s6  ;;  %v1336_v6 = vld [vmem:[%s220_s30 + $0x18] sm:$0xff]   ;;  %v1339_v7 = vld [vmem:[%s220_s30 + $0x20] sm:$0xff]  }
  0x12   : > { %v1342_v8 = vld [vmem:[%s220_s30 + $0x28] sm:$0xff]   ;;  %v1345_v9 = vld [vmem:[%s220_s30 + $0x30] sm:$0xff]   ;;  %v1348_v10 = vld [vmem:[%s220_s30 + $0x38] sm:$0xff]  }
  0x15   : > { %300 = vrot.lane.b32.xlu0 %v1330_v4, %s1271_s6  ;;  %304 = vrot.lane.b32.xlu1 %v1336_v6, %s1271_s6 }
  0x19   : > { %306 = vrot.lane.b32.xlu0 %v1339_v7, %s1271_s6  ;;  %308 = vrot.lane.b32.xlu1 %v1342_v8, %s1271_s6 }
  0x1d   : > { %310 = vrot.lane.b32.xlu0 %v1345_v9, %s1271_s6  ;;  %312 = vrot.lane.b32.xlu1 %v1348_v10, %s1271_s6 }
  0x83   : > { %v299_v11 = vpop.permute.xlu0 %298  ;;  %v303_v12 = vpop.permute.xlu1 %302 }
  0x84   : > { %1107 = vmatprep.mubr.msk.bf16.mxu0 %vm332_vm0, %v299_v11 }
  0x87   : > { %v301_v13 = vpop.permute.xlu0 %300  ;;  %v305_v14 = vpop.permute.xlu1 %304 }
  0x88   : > { %1108 = vmatmul.mubr.msk.bf16.vlgmr.msra.gmra.mrb[0].mxu0 %vm332_vm0, %v301_v13 }
  0x89   : > { %1111 = vmatprep.mubr.msk.bf16.mxu0 %vm332_vm0, %v303_v12 }
  0x8b   : > { %v307_v15 = vpop.permute.xlu0 %306  ;;  %v309_v16 = vpop.permute.xlu1 %308 }
  0x8c   : > { %1115 = vmatprep.mubr.msk.bf16.mxu1 %vm332_vm0, %v307_v15 }
  0x8d   : > { %1116 = vmatmul.mubr.msk.bf16.vlgmr.msra.gmra.mrb[0].mxu1 %vm332_vm0, %v309_v16 }
  0x8e   : > { %1124 = vmatpush3.bf16.msra.mxu1 %v1194_v19 }
  0x8f   : > { %v311_v17 = vpop.permute.xlu0 %310  ;;  %v313_v18 = vpop.permute.xlu1 %312  ;;  %1125 = vmatprep.subr.bf16.mxu1 %v1195_v20 }
  0x90   : > { %1112 = vmatmul.mubr.msk.bf16.gmra.mrb[4].mxu0 %vm332_vm0, %v305_v14  ;;  %1119 = vmatprep.mubr.msk.bf16.mxu1 %vm332_vm0, %v311_v17 }
  0x92   : > { %1126 = vmatpush3.bf16.msra.mxu1 %v1195_v20 }
  0x93   : > { %1127 = vmatprep.subr.bf16.mxu1 %v1196_v21 }
  0x95   : > { %1120 = vmatmul.mubr.msk.bf16.gmra.mrb[4].mxu1 %vm332_vm0, %v313_v18 }
  0x96   : > { %1128 = vmatpush3.bf16.msra.mxu1 %v1196_v21 }
 0x15b   : > { %v1109_v23 = vpop.f32.mrb[0].mxu0 }
 0x15c   : > { %v400_v24 = vadd.f32 %v1109_v23, %v1372_v22  ;;  %v391_v25 = vpop.f32.mrb[1].mxu0 }
 0x15d   : > { %v392_v26 = vadd.f32 %v1372_v22, %v391_v25  ;;  %v1110_v27 = vpop.f32.mrb[2].mxu0 }
 0x15e   : > { %v403_v28 = vadd.f32 %v1110_v27, %v1372_v22  ;;  %v394_v29 = vpop.f32.mrb[3].mxu0  ;;  %v456_v31 = vmax.f32 %v400_v24, 0.0  ;;  %v1197_v24 = vld [vmem:[%s1500_s3] sm:$0xff]  }
 0x15f   : > { %v395_v30 = vadd.f32 %v1372_v22, %v394_v29  ;;  %v454_v33 = vmax.f32 %v392_v26, 0.0  ;;  %1145 = vmatprep.subr.bf16.mxu0 %v1197_v24 }
 0x160   : > { %v457_v32 = vmax.f32 %v403_v28, 0.0  ;;  %v1117_v35 = vpop.f32.mrb[0].mxu1  ;;  %1146 = vmatpush3.bf16.msra.mxu0 %v1197_v24 }
 0x161   : > { %v455_v34 = vmax.f32 %v395_v30, 0.0  ;;  %v432_v37 = vadd.f32 %v1117_v35, %v1372_v22  ;;  %v423_v38 = vpop.f32.mrb[1].mxu1 }
 0x162   : > { %v471_v36 = vpack.c.bf16 %v457_v32, %v456_v31  ;;  %v424_v41 = vadd.f32 %v1372_v22, %v423_v38  ;;  %v1118_v42 = vpop.f32.mrb[2].mxu1 }
 0x163   : > { %v470_v39 = vpack.c.bf16 %v455_v34, %v454_v33  ;;  %v1113_v40 = vpop.f32.mrb[4].mxu0  ;;  %v464_v45 = vmax.f32 %v432_v37, 0.0  ;;  %v435_v46 = vadd.f32 %v1118_v42, %v1372_v22  ;;  %v426_v47 = vpop.f32.mrb[3].mxu1 }
 0x164   : > { %v416_v43 = vadd.f32 %v1113_v40, %v1372_v22  ;;  %488 = vrot.lane.b32.xlu1 %v471_v36, %s1272_s15  ;;  %v407_v44 = vpop.f32.mrb[5].mxu0  ;;  %v462_v50 = vmax.f32 %v424_v41, 0.0  ;;  %v427_v51 = vadd.f32 %v1372_v22, %v426_v47 }
 0x165   : > { %v408_v48 = vadd.f32 %v1372_v22, %v407_v44  ;;  %v1114_v49 = vpop.f32.mrb[6].mxu0  ;;  %486 = vrot.lane.b32.xlu0 %v470_v39, %s1272_s15  ;;  %v465_v54 = vmax.f32 %v435_v46, 0.0 }
 0x166   : > { %v419_v52 = vadd.f32 %v1114_v49, %v1372_v22  ;;  %v410_v53 = vpop.f32.mrb[7].mxu0  ;;  %v463_v56 = vmax.f32 %v427_v51, 0.0  ;;  %v460_v57 = vmax.f32 %v416_v43, 0.0 }
 0x167   : > { %v411_v55 = vadd.f32 %v1372_v22, %v410_v53  ;;  %v475_v59 = vpack.c.bf16 %v465_v54, %v464_v45  ;;  %v458_v60 = vmax.f32 %v408_v48, 0.0 }
 0x168   : > { %v461_v58 = vmax.f32 %v419_v52, 0.0  ;;  %v474_v62 = vpack.c.bf16 %v463_v56, %v462_v50  ;;  %v1121_v63 = vpop.f32.mrb[4].mxu1 }
 0x169   : > { %v459_v61 = vmax.f32 %v411_v55, 0.0  ;;  %v448_v1 = vadd.f32 %v1121_v63, %v1372_v22  ;;  %v439_v2 = vpop.f32.mrb[5].mxu1 }
 0x16a   : > { %v473_v0 = vpack.c.bf16 %v461_v58, %v460_v57  ;;  %v440_v12 = vadd.f32 %v1372_v22, %v439_v2  ;;  %v1122_v13 = vpop.f32.mrb[6].mxu1 }
 0x16b   : > { %v472_v11 = vpack.c.bf16 %v459_v61, %v458_v60  ;;  %v468_v14 = vmax.f32 %v448_v1, 0.0  ;;  %v451_v15 = vadd.f32 %v1122_v13, %v1372_v22  ;;  %v442_v16 = vpop.f32.mrb[7].mxu1 }
 0x16c   : > { %492 = vrot.lane.b32.xlu1 %v473_v0, %s1272_s15  ;;  %v466_v17 = vmax.f32 %v440_v12, 0.0  ;;  %v443_v18 = vadd.f32 %v1372_v22, %v442_v16 }
 0x16d   : > { %490 = vrot.lane.b32.xlu0 %v472_v11, %s1272_s15  ;;  %v469_v19 = vmax.f32 %v451_v15, 0.0 }
 0x16e   : > { %v467_v20 = vmax.f32 %v443_v18, 0.0 }
 0x16f   : > { %v477_v21 = vpack.c.bf16 %v469_v19, %v468_v14 }
 0x170   : > { %496 = vrot.lane.b32.xlu1 %v475_v59, %s1272_s15  ;;  %v476_v23 = vpack.c.bf16 %v467_v20, %v466_v17 }
 0x171   : > { %494 = vrot.lane.b32.xlu0 %v474_v62, %s1272_s15 }
 0x174   : > { %500 = vrot.lane.b32.xlu1 %v477_v21, %s1272_s15 }
 0x175   : > { %498 = vrot.lane.b32.xlu0 %v476_v23, %s1272_s15 }
 0x178   : > { %707 = vrot.lane.b32.xlu1 %v1372_v22, %s1274_s23 }
 0x179   : > { %551 = vrot.lane.b32.xlu0 %v1372_v22, %s1273_s19 }
 0x1d6   : > { %v489_v25 = vpop.permute.xlu1 %488 }
 0x1d7   : > { %v487_v26 = vpop.permute.xlu0 %486  ;;  %v508_v28 = vsel %vm502_vm1, %v1330_v4, %v489_v25 }
 0x1d8   : > { %v505_v27 = vsel %vm502_vm1, %v1328_v3, %v487_v26 }
 0x1d9   : > { %1129 = vmatprep.mubr.msk.bf16.mxu1 %vm332_vm0, %v505_v27 }
 0x1da   : > { %1130 = vmatmul.mubr.msk.bf16.vlgmr.msra.gmra.mrb[8].mxu1 %vm332_vm0, %v508_v28 }
 0x1de   : > { %v493_v29 = vpop.permute.xlu1 %492 }
 0x1df   : > { %v491_v30 = vpop.permute.xlu0 %490  ;;  %v514_v32 = vsel %vm502_vm1, %v1336_v6, %v493_v29 }
 0x1e0   : > { %v511_v31 = vsel %vm502_vm1, %v1333_v5, %v491_v30 }
 0x1e1   : > { %1133 = vmatprep.mubr.msk.bf16.mxu1 %vm332_vm0, %v511_v31 }
 0x1e2   : > { %1134 = vmatmul.mubr.msk.bf16.gmra.mrb[12].mxu1 %vm332_vm0, %v514_v32  ;;  %v497_v33 = vpop.permute.xlu1 %496 }
 0x1e3   : > { %v495_v3 = vpop.permute.xlu0 %494  ;;  %v520_v5 = vsel %vm502_vm1, %v1342_v8, %v497_v33 }
 0x1e4   : > { %v517_v4 = vsel %vm502_vm1, %v1339_v7, %v495_v3  ;;  %v1198_v7 = vld [vmem:[%s1500_s3 + $0x8] sm:$0xff]  }
 0x1e5   : > { %1137 = vmatprep.mubr.msk.bf16.mxu1 %vm332_vm0, %v517_v4  ;;  %1147 = vmatprep.subr.bf16.mxu0 %v1198_v7 }
 0x1e6   : > { %v501_v6 = vpop.permute.xlu1 %500  ;;  %1148 = vmatpush3.bf16.msra.mxu0 %v1198_v7 }
 0x1e7   : > { %v499_v34 = vpop.permute.xlu0 %498  ;;  %v526_v36 = vsel %vm502_vm1, %v1348_v10, %v501_v6 }
 0x1e8   : > { %v523_v35 = vsel %vm502_vm1, %v1345_v9, %v499_v34 }
 0x1ea   : > { %1138 = vmatmul.mubr.msk.bf16.gmra.mrb[16].mxu1 %vm332_vm0, %v520_v5  ;;  %v1438_v33 = vpop.permute.xlu1 %707 }
 0x1eb   : > { %1141 = vmatprep.mubr.msk.bf16.mxu1 %vm332_vm0, %v523_v35  ;;  %v552_v8 = vpop.permute.xlu0 %551 }
 0x1f2   : > { %1142 = vmatmul.mubr.msk.bf16.gmra.mrb[20].mxu1 %vm332_vm0, %v526_v36 }
 0x2ad   : > { %v1131_v9 = vpop.f32.mrb[8].mxu1 }
 0x2ae   : > { %v604_v37 = vpop.f32.mrb[9].mxu1  ;;  %v613_v38 = vadd.f32 %v1131_v9, %v552_v8 }
 0x2af   : > { %v605_v39 = vadd.f32 %v604_v37, %v552_v8  ;;  %v1132_v40 = vpop.f32.mrb[10].mxu1 }
 0x2b0   : > { %v616_v41 = vadd.f32 %v1132_v40, %v552_v8  ;;  %v607_v42 = vpop.f32.mrb[11].mxu1  ;;  %v669_v43 = vmax.f32 %v613_v38, 0.0 }
 0x2b1   : > { %v608_v10 = vadd.f32 %v607_v42, %v552_v8  ;;  %v667_v45 = vmax.f32 %v605_v39, 0.0 }
 0x2b2   : > { %v670_v44 = vmax.f32 %v616_v41, 0.0 }
 0x2b3   : > { %v668_v46 = vmax.f32 %v608_v10, 0.0 }
 0x2b4   : > { %v684_v47 = vpack.c.bf16 %v670_v44, %v669_v43 }
 0x2b5   : > { %v683_v48 = vpack.c.bf16 %v668_v46, %v667_v45  ;;  %v1135_v49 = vpop.f32.mrb[12].mxu1 }
 0x2b6   : > { %v629_v50 = vadd.f32 %v1135_v49, %v552_v8  ;;  %v620_v51 = vpop.f32.mrb[13].mxu1 }
 0x2b7   : > { %v621_v22 = vadd.f32 %v620_v51, %v552_v8  ;;  %v1136_v52 = vpop.f32.mrb[14].mxu1  ;;  %1149 = vmatprep.mubr.msk.bf16.mxu0 %vm710_vm2, %v683_v48 }
 0x2b8   : > { %v632_v53 = vadd.f32 %v1136_v52, %v552_v8  ;;  %v623_v54 = vpop.f32.mrb[15].mxu1  ;;  %1150 = vmatmul.mubr.msk.bf16.vlgmr.msra.gmra.mrb[8].mxu0 %vm710_vm2, %v684_v47  ;;  %v673_v56 = vmax.f32 %v629_v50, 0.0 }
 0x2b9   : > { %v624_v55 = vadd.f32 %v623_v54, %v552_v8  ;;  %v671_v58 = vmax.f32 %v621_v22, 0.0 }
 0x2ba   : > { %v674_v57 = vmax.f32 %v632_v53, 0.0 }
 0x2bb   : > { %v672_v59 = vmax.f32 %v624_v55, 0.0 }
 0x2bc   : > { %v686_v60 = vpack.c.bf16 %v674_v57, %v673_v56 }
 0x2bd   : > { %v685_v61 = vpack.c.bf16 %v672_v59, %v671_v58  ;;  %v1139_v62 = vpop.f32.mrb[16].mxu1 }
 0x2be   : > { %v645_v63 = vadd.f32 %v1139_v62, %v552_v8  ;;  %v636_v0 = vpop.f32.mrb[17].mxu1 }
 0x2bf   : > { %v637_v1 = vadd.f32 %v636_v0, %v552_v8  ;;  %v1140_v2 = vpop.f32.mrb[18].mxu1  ;;  %1153 = vmatprep.mubr.msk.bf16.mxu0 %vm710_vm2, %v685_v61 }
 0x2c0   : > { %v648_v11 = vadd.f32 %v1140_v2, %v552_v8  ;;  %v639_v12 = vpop.f32.mrb[19].mxu1  ;;  %1154 = vmatmul.mubr.msk.bf16.gmra.mrb[12].mxu0 %vm710_vm2, %v686_v60  ;;  %v677_v14 = vmax.f32 %v645_v63, 0.0 }
 0x2c1   : > { %v640_v13 = vadd.f32 %v639_v12, %v552_v8  ;;  %v675_v16 = vmax.f32 %v637_v1, 0.0 }
 0x2c2   : > { %v678_v15 = vmax.f32 %v648_v11, 0.0 }
 0x2c3   : > { %v676_v17 = vmax.f32 %v640_v13, 0.0 }
 0x2c4   : > { %v688_v18 = vpack.c.bf16 %v678_v15, %v677_v14 }
 0x2c5   : > { %v687_v19 = vpack.c.bf16 %v676_v17, %v675_v16  ;;  %v1143_v20 = vpop.f32.mrb[20].mxu1 }
 0x2c6   : > { %v661_v21 = vadd.f32 %v1143_v20, %v552_v8  ;;  %v652_v23 = vpop.f32.mrb[21].mxu1 }
 0x2c7   : > { %v653_v24 = vadd.f32 %v652_v23, %v552_v8  ;;  %v1144_v25 = vpop.f32.mrb[22].mxu1  ;;  %1157 = vmatprep.mubr.msk.bf16.mxu0 %vm710_vm2, %v687_v19 }
 0x2c8   : > { %v664_v26 = vadd.f32 %v1144_v25, %v552_v8  ;;  %v655_v27 = vpop.f32.mrb[23].mxu1  ;;  %1158 = vmatmul.mubr.msk.bf16.gmra.mrb[16].mxu0 %vm710_vm2, %v688_v18  ;;  %v681_v29 = vmax.f32 %v661_v21, 0.0 }
 0x2c9   : > { %v656_v28 = vadd.f32 %v655_v27, %v552_v8  ;;  %v679_v31 = vmax.f32 %v653_v24, 0.0 }
 0x2ca   : > { %v682_v30 = vmax.f32 %v664_v26, 0.0 }
 0x2cb   : > { %v680_v32 = vmax.f32 %v656_v28, 0.0 }
 0x2cc   : > { %v690_v3 = vpack.c.bf16 %v682_v30, %v681_v29 }
 0x2cd   : > { %v689_v4 = vpack.c.bf16 %v680_v32, %v679_v31 }
 0x2cf   : > { %1161 = vmatprep.mubr.msk.bf16.mxu0 %vm710_vm2, %v689_v4 }
 0x2d0   : > { %1162 = vmatmul.mubr.msk.bf16.gmra.mrb[20].mxu0 %vm710_vm2, %v690_v3 }
 0x38b   : > { %v1151_v34 = vpop.f32.mrb[8].mxu0 }
 0x38c   : > { %v778_v35 = vadd.f32 %v1151_v34, %v1438_v33  ;;  %v769_v5 = vpop.f32.mrb[9].mxu0 }
 0x38d   : > { %v770_v6 = vadd.f32 %v769_v5, %v1438_v33  ;;  %v1152_v36 = vpop.f32.mrb[10].mxu0 }
 0x38e   : > { %v1053_v7 = vmul.f32 -1.442695, %v778_v35  ;;  %v781_v8 = vadd.f32 %v1152_v36, %v1438_v33  ;;  %v772_v9 = vpop.f32.mrb[11].mxu0 }
 0x38f   : > { %v1051_v37 = vmul.f32 -1.442695, %v770_v6  ;;  %v773_v38 = vadd.f32 %v772_v9, %v1438_v33 }
 0x390   : > { %1199 = vpow2.f32 %v1053_v7  ;;  %v1054_v39 = vmul.f32 -1.442695, %v781_v8 }
 0x391   : > { %1201 = vpow2.f32 %v1051_v37  ;;  %v1052_v40 = vmul.f32 -1.442695, %v773_v38 }
 0x392   : > { %1203 = vpow2.f32 %v1054_v39 }
 0x393   : > { %1205 = vpow2.f32 %v1052_v40  ;;  %v1155_v41 = vpop.f32.mrb[12].mxu0 }
 0x394   : > { %v794_v42 = vadd.f32 %v1155_v41, %v1438_v33  ;;  %v785_v10 = vpop.f32.mrb[13].mxu0 }
 0x395   : > { %v786_v43 = vadd.f32 %v785_v10, %v1438_v33  ;;  %v1156_v44 = vpop.f32.mrb[14].mxu0 }
 0x396   : > { %v1057_v45 = vmul.f32 -1.442695, %v794_v42  ;;  %v797_v46 = vadd.f32 %v1156_v44, %v1438_v33  ;;  %v788_v47 = vpop.f32.mrb[15].mxu0 }
 0x397   : > { %v1055_v48 = vmul.f32 -1.442695, %v786_v43  ;;  %v789_v49 = vadd.f32 %v788_v47, %v1438_v33 }
 0x398   : > { %1207 = vpow2.f32 %v1057_v45  ;;  %v1058_v50 = vmul.f32 -1.442695, %v797_v46 }
 0x399   : > { %1209 = vpow2.f32 %v1055_v48  ;;  %v1056_v51 = vmul.f32 -1.442695, %v789_v49 }
 0x39a   : > { %v1200_v22 = vpop.eup %1199  ;;  %1211 = vpow2.f32 %v1058_v50 }
 0x39b   : > { %v1202_v52 = vpop.eup %1201  ;;  %v882_v53 = vadd.f32 1.0, %v1200_v22  ;;  %1213 = vpow2.f32 %v1056_v51  ;;  %v1159_v54 = vpop.f32.mrb[16].mxu0 }
 0x39c   : > { %v1204_v55 = vpop.eup %1203  ;;  %v880_v56 = vadd.f32 1.0, %v1202_v52  ;;  %v810_v57 = vadd.f32 %v1159_v54, %v1438_v33  ;;  %v801_v58 = vpop.f32.mrb[17].mxu0 }
 0x39d   : > { %v1206_v59 = vpop.eup %1205  ;;  %1215 = vrcp.f32 %v882_v53  ;;  %v883_v60 = vadd.f32 1.0, %v1204_v55  ;;  %v802_v61 = vadd.f32 %v801_v58, %v1438_v33  ;;  %v1160_v62 = vpop.f32.mrb[18].mxu0 }
 0x39e   : > { %1217 = vrcp.f32 %v880_v56  ;;  %v881_v63 = vadd.f32 1.0, %v1206_v59  ;;  %v1061_v0 = vmul.f32 -1.442695, %v810_v57  ;;  %v813_v1 = vadd.f32 %v1160_v62, %v1438_v33  ;;  %v804_v2 = vpop.f32.mrb[19].mxu0 }
 0x39f   : > { %1219 = vrcp.f32 %v883_v60  ;;  %v1059_v11 = vmul.f32 -1.442695, %v802_v61  ;;  %v805_v12 = vadd.f32 %v804_v2, %v1438_v33 }
 0x3a0   : > { %1221 = vrcp.f32 %v881_v63  ;;  %v1062_v13 = vmul.f32 -1.442695, %v813_v1 }
 0x3a1   : > { %1223 = vpow2.f32 %v1061_v0  ;;  %v1060_v14 = vmul.f32 -1.442695, %v805_v12 }
 0x3a2   : > { %v1208_v15 = vpop.eup %1207  ;;  %1225 = vpow2.f32 %v1059_v11 }
 0x3a3   : > { %v1210_v16 = vpop.eup %1209  ;;  %v886_v17 = vadd.f32 1.0, %v1208_v15  ;;  %1227 = vpow2.f32 %v1062_v13  ;;  %v1163_v18 = vpop.f32.mrb[20].mxu0 }
 0x3a4   : > { %v1212_v19 = vpop.eup %1211  ;;  %v884_v20 = vadd.f32 1.0, %v1210_v16  ;;  %1229 = vpow2.f32 %v1060_v14  ;;  %v826_v21 = vadd.f32 %v1163_v18, %v1438_v33  ;;  %v817_v23 = vpop.f32.mrb[21].mxu0 }
 0x3a5   : > { %v1214_v24 = vpop.eup %1213  ;;  %1231 = vrcp.f32 %v886_v17  ;;  %v887_v25 = vadd.f32 1.0, %v1212_v19  ;;  %v818_v26 = vadd.f32 %v817_v23, %v1438_v33  ;;  %v1164_v27 = vpop.f32.mrb[22].mxu0 }
 0x3a6   : > { %1233 = vrcp.f32 %v884_v20  ;;  %v885_v28 = vadd.f32 1.0, %v1214_v24  ;;  %v1065_v29 = vmul.f32 -1.442695, %v826_v21  ;;  %v829_v30 = vadd.f32 %v1164_v27, %v1438_v33  ;;  %v820_v31 = vpop.f32.mrb[23].mxu0 }
 0x3a7   : > { %v1216_v32 = vpop.eup %1215  ;;  %1235 = vrcp.f32 %v887_v25  ;;  %v1063_v3 = vmul.f32 -1.442695, %v818_v26  ;;  %v821_v4 = vadd.f32 %v820_v31, %v1438_v33 }
 0x3a8   : > { %v1218_v34 = vpop.eup %1217  ;;  %931 = vst.msk [vmem:[%s1457_s27 + $0x10] sm:$0xff] %vm928_vm3, %v1216_v32  ;;  %1237 = vrcp.f32 %v885_v28  ;;  %v1066_v35 = vmul.f32 -1.442695, %v829_v30 }
 0x3a9   : > { %v1220_v5 = vpop.eup %1219  ;;  %929 = vst.msk [vmem:[%s1457_s27] sm:$0xff] %vm928_vm3, %v1218_v34  ;;  %1239 = vpow2.f32 %v1065_v29  ;;  %v1064_v6 = vmul.f32 -1.442695, %v821_v4 }
 0x3aa   : > { %v1222_v36 = vpop.eup %1221  ;;  %932 = vst.msk [vmem:[%s1457_s27 + $0x18] sm:$0xff] %vm928_vm3, %v1220_v5  ;;  %1241 = vpow2.f32 %v1063_v3 }
 0x3ab   : > { %v1224_v7 = vpop.eup %1223  ;;  %930 = vst.msk [vmem:[%s1457_s27 + $0x8] sm:$0xff] %vm928_vm3, %v1222_v36  ;;  %1243 = vpow2.f32 %v1066_v35 }
 0x3ac   : > { %v1226_v33 = vpop.eup %1225  ;;  %v890_v8 = vadd.f32 1.0, %v1224_v7  ;;  %1245 = vpow2.f32 %v1064_v6 }
 0x3ad   : > { %v1228_v9 = vpop.eup %1227  ;;  %v888_v37 = vadd.f32 1.0, %v1226_v33 }
 0x3ae   : > { %v1230_v38 = vpop.eup %1229  ;;  %1247 = vrcp.f32 %v890_v8  ;;  %v891_v39 = vadd.f32 1.0, %v1228_v9 }
 0x3af   : > { %v1232_v40 = vpop.eup %1231  ;;  %1249 = vrcp.f32 %v888_v37  ;;  %v889_v41 = vadd.f32 1.0, %v1230_v38 }
 0x3b0   : > { %v1234_v42 = vpop.eup %1233  ;;  %935 = vst.msk [vmem:[%s1457_s27 + $0x30] sm:$0xff] %vm928_vm3, %v1232_v40  ;;  %1251 = vrcp.f32 %v891_v39 }
 0x3b1   : > { %v1236_v10 = vpop.eup %1235  ;;  %933 = vst.msk [vmem:[%s1457_s27 + $0x20] sm:$0xff] %vm928_vm3, %v1234_v42  ;;  %1253 = vrcp.f32 %v889_v41 }
 0x3b2   : > { %v1238_v43 = vpop.eup %1237  ;;  %936 = vst.msk [vmem:[%s1457_s27 + $0x38] sm:$0xff] %vm928_vm3, %v1236_v10 }
 0x3b3   : > { %v1240_v44 = vpop.eup %1239  ;;  %934 = vst.msk [vmem:[%s1457_s27 + $0x28] sm:$0xff] %vm928_vm3, %v1238_v43 }
 0x3b4   : > { %v1242_v45 = vpop.eup %1241  ;;  %v894_v46 = vadd.f32 1.0, %v1240_v44 }
 0x3b5   : > { %v1244_v47 = vpop.eup %1243  ;;  %v892_v48 = vadd.f32 1.0, %v1242_v45 }
 0x3b6   : > { %v1246_v49 = vpop.eup %1245  ;;  %1255 = vrcp.f32 %v894_v46  ;;  %v895_v50 = vadd.f32 1.0, %v1244_v47 }
 0x3b7   : > { %1257 = vrcp.f32 %v892_v48  ;;  %v893_v51 = vadd.f32 1.0, %v1246_v49 }
 0x3b8   : > { %v1248_v22 = vpop.eup %1247  ;;  %1259 = vrcp.f32 %v895_v50 }
 0x3b9   : > { %v1250_v52 = vpop.eup %1249  ;;  %939 = vst.msk [vmem:[%s1457_s27 + $0x50] sm:$0xff] %vm928_vm3, %v1248_v22  ;;  %1261 = vrcp.f32 %v893_v51 }
 0x3ba   : > { %v1252_v53 = vpop.eup %1251  ;;  %937 = vst.msk [vmem:[%s1457_s27 + $0x40] sm:$0xff] %vm928_vm3, %v1250_v52 }
 0x3bb   : > { %v1254_v54 = vpop.eup %1253  ;;  %940 = vst.msk [vmem:[%s1457_s27 + $0x58] sm:$0xff] %vm928_vm3, %v1252_v53 }
 0x3bc   : > { %938 = vst.msk [vmem:[%s1457_s27 + $0x48] sm:$0xff] %vm928_vm3, %v1254_v54 }
 0x3c0   : > { %v1256_v55 = vpop.eup %1255 }
 0x3c1   : > { %v1258_v56 = vpop.eup %1257  ;;  %943 = vst.msk [vmem:[%s1457_s27 + $0x70] sm:$0xff] %vm928_vm3, %v1256_v55 }
 0x3c2   : > { %v1260_v57 = vpop.eup %1259  ;;  %941 = vst.msk [vmem:[%s1457_s27 + $0x60] sm:$0xff] %vm928_vm3, %v1258_v56 }
 0x3c3   : > { %v1262_v58 = vpop.eup %1261  ;;  %944 = vst.msk [vmem:[%s1457_s27 + $0x78] sm:$0xff] %vm928_vm3, %v1260_v57 }
 0x3c4   : > { %942 = vst.msk [vmem:[%s1457_s27 + $0x68] sm:$0xff] %vm928_vm3, %v1262_v58 }
 0x3c5 PF: > { %s15_s18 = sadd.s32 1, %s1269_s18  }
 0x3c6   : > { %p12_p4 = scmp.ge.s32.totalorder %s15_s18, 6  }
 0x3c8   :  { %14 = sbr.rel (!%p12_p4) target bundleno = 1 (0x1), region = 70 }

</bundles_post_ra>
